<compile_context>
chip_gen: v7x
topology: tpu7x:2x2x1
jax: 0.10.0
libtpu: 0.0.40
codegen_flags: <defaults>
</compile_context>

<pallas_src>
import jax
import jax.numpy as jnp
from jax.experimental import pallas as pl
from jax.experimental.pallas import tpu as pltpu


# --------------------------------------------------------------------------- #
# helpers
# --------------------------------------------------------------------------- #
def _round_up(v: int, m: int) -> int:
    return (v + m - 1) // m * m


def _cdiv(a: int, b: int) -> int:
    return (a + b - 1) // b


def _sublane_pack(dtype) -> int:
    # sublane packing: 8 for 32-bit, 16 for 16-bit, 32 for 8-bit dtypes
    return {4: 8, 2: 16, 1: 32}.get(jnp.dtype(dtype).itemsize, 8)


def _gelu_tanh(x):
    # tanh-approximate GELU; tanh lowers to the EUP (separate bundle slot).
    c = 0.7978845608028654  # sqrt(2/pi)
    return 0.5 * x * (1.0 + jnp.tanh(c * (x + 0.044715 * (x * x * x))))


def _vmem_capacity_bytes() -> int:
    try:
        return int(pltpu.get_tpu_info().vmem_capacity_bytes)
    except Exception:
        return 64 * 2**20  # conservative (v7x-sized) fallback


# --------------------------------------------------------------------------- #
# kernel
# --------------------------------------------------------------------------- #
def _mlp_kernel(x_ref, w1_ref, w2_ref, o_ref, acc_ref):
    # x_ref:   (tm, Dp)   row tile of tokens
    # w1_ref:  (Dp, tH)   fc1 weight chunk
    # w2_ref:  (tH, Dop)  fc2 weight chunk
    # o_ref:   (tm, Dop)
    # acc_ref: (tm, Dop)  f32 accumulator across the H axis
    h = pl.program_id(1)

    @pl.when(h == 0)
    def _():
        acc_ref[...] = jnp.zeros_like(acc_ref)

    hid = jnp.dot(x_ref[...], w1_ref[...],
                  preferred_element_type=jnp.float32)          # fc1 (MXU)
    hid = _gelu_tanh(hid)                                       # act (VPU/EUP)
    acc_ref[...] += jnp.dot(hid.astype(w2_ref.dtype), w2_ref[...],
                            preferred_element_type=jnp.float32)  # fc2 (MXU)

    @pl.when(h == pl.num_programs(1) - 1)
    def _():
        o_ref[...] = acc_ref[...].astype(o_ref.dtype)


# --------------------------------------------------------------------------- #
# wrapper
# --------------------------------------------------------------------------- #
def mlp_forward(x: jax.Array, w1: jax.Array, w2: jax.Array,
                *, tile_m: int | None = None, tile_h: int | None = None,
                cast_to_bf16: bool = False) -> jax.Array:
    """Pallas implementation of Mlp.forward: gelu(x @ w1) @ w2.

    x:  (..., D)  tokens-last layout (as nn.Linear expects).
    w1: (D, H)    fc1 weight, stored (in_features, out_features).
    w2: (H, Do)   fc2 weight, stored (in_features, out_features).
    cast_to_bf16: cast f32 operands to bf16 for the MXU (f32 accumulation).
    """
    orig_shape = x.shape
    D = orig_shape[-1]
    H = w1.shape[1]
    Do = w2.shape[1]
    assert w1.shape[0] == D and w2.shape[0] == H

    out_dtype = x.dtype
    compute_dtype = x.dtype
    if cast_to_bf16 and jnp.dtype(x.dtype) == jnp.float32:
        compute_dtype = jnp.bfloat16

    x2 = x.reshape(-1, D).astype(compute_dtype)
    w1c = w1.astype(compute_dtype)
    w2c = w2.astype(compute_dtype)
    M = x2.shape[0]

    ci = jnp.dtype(compute_dtype).itemsize
    oi = jnp.dtype(out_dtype).itemsize
    pack = _sublane_pack(compute_dtype)

    # Lane-dense padding of the feature dims (zeros are exact: gelu(0) == 0).
    d_pad = _round_up(D, 128)
    do_pad = _round_up(Do, 128)
    h_pad = _round_up(H, 128)

    vmem_cap = _vmem_capacity_bytes()
    budget = int(0.65 * vmem_cap)            # tile-selection budget
    small_vmem = vmem_cap <= 80 * 2**20      # v7x-like: 64 MiB/TC, 2 TCs/chip

    # ---- row tile -----------------------------------------------------------
    if tile_m is None:
        tile_m = 256 if small_vmem else 512
    tm = min(tile_m, M)
    if small_vmem and M > 2 * pack:
        # Guarantee >= 2 row tiles so both TensorCores get work on v7x.
        tm = min(tm, _cdiv(M, 2))
    tm = _round_up(max(tm, 1), pack)
    if tm >= 128:
        tm = _round_up(tm, 128)              # MXU-aligned row tiles

    # ---- hidden tile + honest VMEM accounting -------------------------------
    def footprint(tm_, th_):
        return (2 * tm_ * d_pad * ci          # x tile (double-buffered)
                + 2 * d_pad * th_ * ci        # w1 tile (assume 2 buffers)
                + 2 * th_ * do_pad * ci       # w2 tile (assume 2 buffers)
                + 2 * tm_ * do_pad * oi       # out tile (double-buffered)
                + tm_ * do_pad * 4            # f32 accumulator scratch
                + 3 * tm_ * th_ * 4)          # f32 hidden + GELU/cast temps

    th = h_pad if tile_h is None else _round_up(max(min(tile_h, h_pad), 1), 128)
    while footprint(tm, th) > budget and th > 128:
        th = _round_up(th // 2, 128)
    while footprint(tm, th) > budget and tm > max(pack, 128):
        tm = max(_round_up(tm // 2, pack), pack)

    h_pad = _round_up(h_pad, th)
    m_pad = _round_up(M, tm)
    num_m = m_pad // tm
    num_h = h_pad // th

    # ---- pad operands --------------------------------------------------------
    if (m_pad, d_pad) != (M, D):
        x2 = jnp.pad(x2, ((0, m_pad - M), (0, d_pad - D)))
    if (d_pad, h_pad) != (D, H):
        w1c = jnp.pad(w1c, ((0, d_pad - D), (0, h_pad - H)))
    if (h_pad, do_pad) != (H, Do):
        w2c = jnp.pad(w2c, ((0, h_pad - H), (0, do_pad - Do)))

    vmem_limit = int(min(0.85 * vmem_cap,
                         max(32 * 2**20, 2 * footprint(tm, th))))

    cost = pl.CostEstimate(
        flops=2 * M * H * (D + Do),
        transcendentals=M * H,
        bytes_accessed=(M * D + D * H + H * Do + M * Do) * ci,
    )

    def make_call(single_buffer_weights: bool):
        def wspec(shape, index_map):
            if single_buffer_weights:
                try:
                    # Weights are resident (constant block index); one buffer
                    # halves their VMEM footprint.
                    return pl.BlockSpec(shape, index_map,
                                        pipeline_mode=pl.Buffered(1))
                except Exception:
                    pass
            return pl.BlockSpec(shape, index_map)

        return pl.pallas_call(
            _mlp_kernel,
            out_shape=jax.ShapeDtypeStruct((m_pad, do_pad), out_dtype),
            grid=(num_m, num_h),
            in_specs=[
                pl.BlockSpec((tm, d_pad), lambda i, h: (i, 0)),   # x row tile
                wspec((d_pad, th), lambda i, h: (0, h)),          # fc1 chunk
                wspec((th, do_pad), lambda i, h: (h, 0)),         # fc2 chunk
            ],
            out_specs=pl.BlockSpec((tm, do_pad), lambda i, h: (i, 0)),
            scratch_shapes=[pltpu.VMEM((tm, do_pad), jnp.float32)],
            compiler_params=pltpu.CompilerParams(
                # rows independent (shards TCs on v7x); H axis is a reduction
                dimension_semantics=("parallel", "arbitrary"),
                vmem_limit_bytes=vmem_limit,
            ),
            cost_estimate=cost,
        )

    single_buf = (num_h == 1)
    try:
        out2 = make_call(single_buf)(x2, w1c, w2c)
    except Exception:
        if not single_buf:
            raise
        out2 = make_call(False)(x2, w1c, w2c)

    out2 = out2[:M, :Do]
    return out2.reshape(*orig_shape[:-1], Do)


# --------------------------------------------------------------------------- #
# demo / self-test
# --------------------------------------------------------------------------- #
if __name__ == "__main__":
    key = jax.random.PRNGKey(0)
    kx, k1, k2, kx2, k3, k4 = jax.random.split(key, 6)

    # --- shapes consistent with the module: batch=2, seq=64, dim=32, ratio=4 --
    B, N, D = 2, 64, 32
    H = 4 * D
    x = jax.random.normal(kx, (B, N, D), dtype=jnp.float32)
    # nn.Linear(bias=False) weights, pre-transposed to (in, out).
    w1 = jax.random.normal(k1, (D, H), dtype=jnp.float32) * 0.05
    w2 = jax.random.normal(k2, (H, D), dtype=jnp.float32) * 0.05

    ref = jnp.dot(_gelu_tanh(jnp.dot(x, w1)), w2)

    # f32 path (strict parity up to the tanh-GELU approximation).
    y = jax.block_until_ready(mlp_forward(x, w1, w2))
    assert y.shape == (B, N, D) and y.dtype == x.dtype
    assert bool(jnp.allclose(y, ref, atol=1e-3, rtol=1e-3))

    # bf16 MXU fast path (f32 accumulation; looser tolerance from the cast).
    y_bf = jax.block_until_ready(mlp_forward(x, w1, w2, cast_to_bf16=True))
    assert y_bf.shape == (B, N, D) and y_bf.dtype == x.dtype
    assert bool(jnp.allclose(y_bf, ref, atol=3e-2, rtol=3e-2))

    # --- a second config exercising the H-tiled accumulation (dim=128) -------
    D2 = 128
    H2 = 4 * D2
    x_b = jax.random.normal(kx2, (B, N, D2), dtype=jnp.float32)
    w1_b = jax.random.normal(k3, (D2, H2), dtype=jnp.float32) * 0.05
    w2_b = jax.random.normal(k4, (H2, D2), dtype=jnp.float32) * 0.05
    ref_b = jnp.dot(_gelu_tanh(jnp.dot(x_b, w1_b)), w2_b)

    y_b = jax.block_until_ready(
        mlp_forward(x_b, w1_b, w2_b, tile_m=64, tile_h=128))  # grid (2, 4)
    assert y_b.shape == (B, N, D2) and y_b.dtype == x_b.dtype
    assert bool(jnp.allclose(y_b, ref_b, atol=1e-3, rtol=1e-3))

    print("KERNEL_OK")
</pallas_src>

<mosaic_0001>
module attributes {stable_mosaic.version = 11 : i64} {
  func.func @_mlp_kernel(%arg0: i32, %arg1: i32, %arg2: memref<64x128xf32, #tpu.memory_space<vmem>>, %arg3: memref<128x128xf32, #tpu.memory_space<vmem>>, %arg4: memref<128x128xf32, #tpu.memory_space<vmem>>, %arg5: memref<64x128xf32, #tpu.memory_space<vmem>>, %arg6: memref<64x128xf32, #tpu.memory_space<vmem>>) attributes {dimension_semantics = [#tpu.dimension_semantics<parallel>, #tpu.dimension_semantics<arbitrary>], iteration_bounds = array<i64: 2, 1>, scalar_prefetch = 0 : i64, scratch_operands = 1 : i64, tpu.core_type = #tpu.core_type<tc>, window_params = [{transform_indices = @transform_0, window_bounds = array<i64: 64, 128>}, {pipeline_mode = #tpu.pipeline_mode<synchronous>, transform_indices = @transform_1, window_bounds = array<i64: 128, 128>}, {pipeline_mode = #tpu.pipeline_mode<synchronous>, transform_indices = @transform_2, window_bounds = array<i64: 128, 128>}, {transform_indices = @transform_3, window_bounds = array<i64: 64, 128>}]} {
    %c0_i32 = arith.constant 0 : i32
    %0 = arith.cmpi eq, %arg1, %c0_i32 : i32
    %1 = arith.extui %0 : i1 to i32
    %c0_i32_0 = arith.constant 0 : i32
    %2 = arith.cmpi ne, %1, %c0_i32_0 : i32
    scf.if %2 {
      %cst_17 = arith.constant 0.000000e+00 : f32
      %27 = vector.broadcast %cst_17 : f32 to vector<64x128xf32>
      %c0_18 = arith.constant 0 : index
      %c0_19 = arith.constant 0 : index
      %28 = vector.load %arg6[%c0_18, %c0_19] : memref<64x128xf32, #tpu.memory_space<vmem>>, vector<64x128xf32>
      tpu.vector_store %arg6[%c0_18, %c0_19], %27 {strides = array<i32>} : memref<64x128xf32, #tpu.memory_space<vmem>>, vector<64x128xf32>,
    } else {
    }
    %c0 = arith.constant 0 : index
    %c0_1 = arith.constant 0 : index
    %3 = vector.load %arg2[%c0, %c0_1] : memref<64x128xf32, #tpu.memory_space<vmem>>, vector<64x128xf32>
    %c0_2 = arith.constant 0 : index
    %c0_3 = arith.constant 0 : index
    %4 = vector.load %arg3[%c0_2, %c0_3] : memref<128x128xf32, #tpu.memory_space<vmem>>, vector<128x128xf32>
    %cst = arith.constant dense<0.000000e+00> : vector<64x128xf32>
    %5 = tpu.matmul %3, %4, %cst {dimension_numbers = #tpu.dot_dimension_numbers<[1], [0], [0], [1], [0, 0, 1, 1], [], []>} : vector<64x128xf32>, vector<128x128xf32>, vector<64x128xf32> -> vector<64x128xf32>
    %cst_4 = arith.constant 5.000000e-01 : f32
    %6 = vector.broadcast %cst_4 : f32 to vector<64x128xf32>
    %7 = arith.mulf %6, %5 : vector<64x128xf32>
    %8 = arith.mulf %5, %5 : vector<64x128xf32>
    %9 = arith.mulf %8, %5 : vector<64x128xf32>
    %cst_5 = arith.constant 4.471500e-02 : f32
    %10 = vector.broadcast %cst_5 : f32 to vector<64x128xf32>
    %11 = arith.mulf %10, %9 : vector<64x128xf32>
    %12 = arith.addf %5, %11 : vector<64x128xf32>
    %cst_6 = arith.constant 0.797884583 : f32
    %13 = vector.broadcast %cst_6 : f32 to vector<64x128xf32>
    %14 = arith.mulf %13, %12 : vector<64x128xf32>
    %15 = math.tanh %14 : vector<64x128xf32>
    %cst_7 = arith.constant 1.000000e+00 : f32
    %16 = vector.broadcast %cst_7 : f32 to vector<64x128xf32>
    %17 = arith.addf %16, %15 : vector<64x128xf32>
    %18 = arith.mulf %7, %17 : vector<64x128xf32>
    %c0_8 = arith.constant 0 : index
    %c0_9 = arith.constant 0 : index
    %19 = vector.load %arg6[%c0_8, %c0_9] : memref<64x128xf32, #tpu.memory_space<vmem>>, vector<64x128xf32>
    %c0_10 = arith.constant 0 : index
    %c0_11 = arith.constant 0 : index
    %20 = vector.load %arg4[%c0_10, %c0_11] : memref<128x128xf32, #tpu.memory_space<vmem>>, vector<128x128xf32>
    %cst_12 = arith.constant dense<0.000000e+00> : vector<64x128xf32>
    %21 = tpu.matmul %18, %20, %cst_12 {dimension_numbers = #tpu.dot_dimension_numbers<[1], [0], [0], [1], [0, 0, 1, 1], [], []>} : vector<64x128xf32>, vector<128x128xf32>, vector<64x128xf32> -> vector<64x128xf32>
    %22 = arith.addf %19, %21 : vector<64x128xf32>
    %c0_13 = arith.constant 0 : index
    %c0_14 = arith.constant 0 : index
    %23 = vector.load %arg6[%c0_13, %c0_14] : memref<64x128xf32, #tpu.memory_space<vmem>>, vector<64x128xf32>
    tpu.vector_store %arg6[%c0_13, %c0_14], %22 {strides = array<i32>} : memref<64x128xf32, #tpu.memory_space<vmem>>, vector<64x128xf32>,
    %c0_i32_15 = arith.constant 0 : i32
    %24 = arith.cmpi eq, %arg1, %c0_i32_15 : i32
    %25 = arith.extui %24 : i1 to i32
    %c0_i32_16 = arith.constant 0 : i32
    %26 = arith.cmpi ne, %25, %c0_i32_16 : i32
    scf.if %26 {
      %c0_17 = arith.constant 0 : index
      %c0_18 = arith.constant 0 : index
      %27 = vector.load %arg6[%c0_17, %c0_18] : memref<64x128xf32, #tpu.memory_space<vmem>>, vector<64x128xf32>
      %c0_19 = arith.constant 0 : index
      %c0_20 = arith.constant 0 : index
      %28 = vector.load %arg5[%c0_19, %c0_20] : memref<64x128xf32, #tpu.memory_space<vmem>>, vector<64x128xf32>
      tpu.vector_store %arg5[%c0_19, %c0_20], %27 {strides = array<i32>} : memref<64x128xf32, #tpu.memory_space<vmem>>, vector<64x128xf32>,
    } else {
    }
    return
  }
  func.func @transform_0(%arg0: i32, %arg1: i32) -> (i32, i32) {
    %c0_i32 = arith.constant 0 : i32
    %c0_i32_0 = arith.constant 0 : i32
    return %arg0, %c0_i32 : i32, i32
  }
  func.func @transform_1(%arg0: i32, %arg1: i32) -> (i32, i32) {
    %c0_i32 = arith.constant 0 : i32
    %c0_i32_0 = arith.constant 0 : i32
    return %c0_i32, %arg1 : i32, i32
  }
  func.func @transform_2(%arg0: i32, %arg1: i32) -> (i32, i32) {
    %c0_i32 = arith.constant 0 : i32
    %c0_i32_0 = arith.constant 0 : i32
    return %arg1, %c0_i32 : i32, i32
  }
  func.func @transform_3(%arg0: i32, %arg1: i32) -> (i32, i32) {
    %c0_i32 = arith.constant 0 : i32
    %c0_i32_0 = arith.constant 0 : i32
    return %arg0, %c0_i32 : i32, i32
  }
}

module attributes {stable_mosaic.version = 11 : i64} {
  func.func @_mlp_kernel(%arg0: i32, %arg1: i32, %arg2: memref<64x128xf32, #tpu.memory_space<vmem>>, %arg3: memref<128x128xf32, #tpu.memory_space<vmem>>, %arg4: memref<128x128xf32, #tpu.memory_space<vmem>>, %arg5: memref<64x128xf32, #tpu.memory_space<vmem>>, %arg6: memref<64x128xf32, #tpu.memory_space<vmem>>) attributes {dimension_semantics = [#tpu.dimension_semantics<parallel>, #tpu.dimension_semantics<arbitrary>], iteration_bounds = array<i64: 2, 1>, scalar_prefetch = 0 : i64, scratch_operands = 1 : i64, tpu.core_type = #tpu.core_type<tc>, window_params = [{transform_indices = @transform_0, window_bounds = array<i64: 64, 128>}, {transform_indices = @transform_1, window_bounds = array<i64: 128, 128>}, {transform_indices = @transform_2, window_bounds = array<i64: 128, 128>}, {transform_indices = @transform_3, window_bounds = array<i64: 64, 128>}]} {
    %c0_i32 = arith.constant 0 : i32
    %0 = arith.cmpi eq, %arg1, %c0_i32 : i32
    %1 = arith.extui %0 : i1 to i32
    %c0_i32_0 = arith.constant 0 : i32
    %2 = arith.cmpi ne, %1, %c0_i32_0 : i32
    scf.if %2 {
      %cst_17 = arith.constant 0.000000e+00 : f32
      %27 = vector.broadcast %cst_17 : f32 to vector<64x128xf32>
      %c0_18 = arith.constant 0 : index
      %c0_19 = arith.constant 0 : index
      %28 = vector.load %arg6[%c0_18, %c0_19] : memref<64x128xf32, #tpu.memory_space<vmem>>, vector<64x128xf32>
      tpu.vector_store %arg6[%c0_18, %c0_19], %27 {strides = array<i32>} : memref<64x128xf32, #tpu.memory_space<vmem>>, vector<64x128xf32>,
    } else {
    }
    %c0 = arith.constant 0 : index
    %c0_1 = arith.constant 0 : index
    %3 = vector.load %arg2[%c0, %c0_1] : memref<64x128xf32, #tpu.memory_space<vmem>>, vector<64x128xf32>
    %c0_2 = arith.constant 0 : index
    %c0_3 = arith.constant 0 : index
    %4 = vector.load %arg3[%c0_2, %c0_3] : memref<128x128xf32, #tpu.memory_space<vmem>>, vector<128x128xf32>
    %cst = arith.constant dense<0.000000e+00> : vector<64x128xf32>
    %5 = tpu.matmul %3, %4, %cst {dimension_numbers = #tpu.dot_dimension_numbers<[1], [0], [0], [1], [0, 0, 1, 1], [], []>} : vector<64x128xf32>, vector<128x128xf32>, vector<64x128xf32> -> vector<64x128xf32>
    %cst_4 = arith.constant 5.000000e-01 : f32
    %6 = vector.broadcast %cst_4 : f32 to vector<64x128xf32>
    %7 = arith.mulf %6, %5 : vector<64x128xf32>
    %8 = arith.mulf %5, %5 : vector<64x128xf32>
    %9 = arith.mulf %8, %5 : vector<64x128xf32>
    %cst_5 = arith.constant 4.471500e-02 : f32
    %10 = vector.broadcast %cst_5 : f32 to vector<64x128xf32>
    %11 = arith.mulf %10, %9 : vector<64x128xf32>
    %12 = arith.addf %5, %11 : vector<64x128xf32>
    %cst_6 = arith.constant 0.797884583 : f32
    %13 = vector.broadcast %cst_6 : f32 to vector<64x128xf32>
    %14 = arith.mulf %13, %12 : vector<64x128xf32>
    %15 = math.tanh %14 : vector<64x128xf32>
    %cst_7 = arith.constant 1.000000e+00 : f32
    %16 = vector.broadcast %cst_7 : f32 to vector<64x128xf32>
    %17 = arith.addf %16, %15 : vector<64x128xf32>
    %18 = arith.mulf %7, %17 : vector<64x128xf32>
    %c0_8 = arith.constant 0 : index
    %c0_9 = arith.constant 0 : index
    %19 = vector.load %arg6[%c0_8, %c0_9] : memref<64x128xf32, #tpu.memory_space<vmem>>, vector<64x128xf32>
    %c0_10 = arith.constant 0 : index
    %c0_11 = arith.constant 0 : index
    %20 = vector.load %arg4[%c0_10, %c0_11] : memref<128x128xf32, #tpu.memory_space<vmem>>, vector<128x128xf32>
    %cst_12 = arith.constant dense<0.000000e+00> : vector<64x128xf32>
    %21 = tpu.matmul %18, %20, %cst_12 {dimension_numbers = #tpu.dot_dimension_numbers<[1], [0], [0], [1], [0, 0, 1, 1], [], []>} : vector<64x128xf32>, vector<128x128xf32>, vector<64x128xf32> -> vector<64x128xf32>
    %22 = arith.addf %19, %21 : vector<64x128xf32>
    %c0_13 = arith.constant 0 : index
    %c0_14 = arith.constant 0 : index
    %23 = vector.load %arg6[%c0_13, %c0_14] : memref<64x128xf32, #tpu.memory_space<vmem>>, vector<64x128xf32>
    tpu.vector_store %arg6[%c0_13, %c0_14], %22 {strides = array<i32>} : memref<64x128xf32, #tpu.memory_space<vmem>>, vector<64x128xf32>,
    %c0_i32_15 = arith.constant 0 : i32
    %24 = arith.cmpi eq, %arg1, %c0_i32_15 : i32
    %25 = arith.extui %24 : i1 to i32
    %c0_i32_16 = arith.constant 0 : i32
    %26 = arith.cmpi ne, %25, %c0_i32_16 : i32
    scf.if %26 {
      %c0_17 = arith.constant 0 : index
      %c0_18 = arith.constant 0 : index
      %27 = vector.load %arg6[%c0_17, %c0_18] : memref<64x128xf32, #tpu.memory_space<vmem>>, vector<64x128xf32>
      %c0_19 = arith.constant 0 : index
      %c0_20 = arith.constant 0 : index
      %28 = vector.load %arg5[%c0_19, %c0_20] : memref<64x128xf32, #tpu.memory_space<vmem>>, vector<64x128xf32>
      tpu.vector_store %arg5[%c0_19, %c0_20], %27 {strides = array<i32>} : memref<64x128xf32, #tpu.memory_space<vmem>>, vector<64x128xf32>,
    } else {
    }
    return
  }
  func.func @transform_0(%arg0: i32, %arg1: i32) -> (i32, i32) {
    %c0_i32 = arith.constant 0 : i32
    %c0_i32_0 = arith.constant 0 : i32
    return %arg0, %c0_i32 : i32, i32
  }
  func.func @transform_1(%arg0: i32, %arg1: i32) -> (i32, i32) {
    %c0_i32 = arith.constant 0 : i32
    %c0_i32_0 = arith.constant 0 : i32
    return %c0_i32, %arg1 : i32, i32
  }
  func.func @transform_2(%arg0: i32, %arg1: i32) -> (i32, i32) {
    %c0_i32 = arith.constant 0 : i32
    %c0_i32_0 = arith.constant 0 : i32
    return %arg1, %c0_i32 : i32, i32
  }
  func.func @transform_3(%arg0: i32, %arg1: i32) -> (i32, i32) {
    %c0_i32 = arith.constant 0 : i32
    %c0_i32_0 = arith.constant 0 : i32
    return %arg0, %c0_i32 : i32, i32
  }
}

</mosaic_0001>

<bundles_post_ra>
// kernel: tpu_custom_call.1
= control target key start
LH: loop header
LB: loop body
LE: loop exit
PB: predicated region body
PF: predicated region fallthrough
CT: control target
= control target key end

     0   :  { %8 = vsyncpa [#allocation4], 0  ;;  %s1561_s0 = inlined_call_operand.hbm [shape: f32[128,128], index: 0, kind: input, shape index: {}]   ;;  %s1562_s1 = inlined_call_operand.hbm [shape: f32[128,128], index: 1, kind: input, shape index: {}]   ;;  %s1563_s2 = inlined_call_operand.hbm [shape: f32[128,128], index: 2, kind: input, shape index: {}]   ;;  %s1564_s3 = inlined_call_operand.hbm [shape: f32[128,128], index: 3, kind: output, shape index: {}]  }
   0x1   :  { %10 = vsyncpa [#allocation4 + $0x1], 0 }
   0x2   :  { %11 = vsyncpa [#allocation7], 0 }
   0x3   :  { %12 = vsyncpa [#allocation5], 0 }
   0x4   :  { %14 = vsyncpa [#allocation5 + $0x1], 0  ;;  %s1269_s12 = smov 0   ;;  %s1271_s13 = smov 0  }
   0x5   :  { %s1273_s14 = smov 0   ;;  %s1275_s15 = smov 0  }
   0x6   :  { %s1277_s16 = smov 0   ;;  %s1279_s17 = smov 0  }
   0x7 LB: > { %s743_s18 = sadd.s32 4294967295, %s1239_s17   ;;  %s744_s19 = sadd.s32 4294967294, %s1239_s17   ;;  %s1239_s17 = sphi %s1279_s17, %s20_s17   ;;  %s1235_s16 = sphi %s1277_s16, %s1586_s16   ;;  %s1231_s15 = sphi %s1275_s15, %s1585_s15   ;;  %s1227_s14 = sphi %s1273_s14, %s1584_s14   ;;  %s1223_s13 = sphi %s1271_s13, %s1583_s13   ;;  %s1219_s12 = sphi %s1269_s12, %s1582_s12  }
   0x8   : > { %p52_p0 = scmp.ne.s32.totalorder %s1223_s13, %s1219_s12  ;;  %p1303_p1 = scmp.eq.s32.totalorder %s743_s18, 0 }
   0x9   : > { %p1307_p2 = scmp.eq.s32.totalorder %s743_s18, 1  ;;  %p134_p3 = scmp.eq.s32.totalorder %s744_s19, 1 }
   0xa   : > { %s1569_s20 = scalar_select %p1303_p1, 1, 0 }
   0xb   : > { %p1313_p4 = por %p1303_p1, %p52_p0  ;;  %p745_p5 = scmp.ge.s32.totalorder %s1239_s17, 1 }
   0xc   : > { %p1318_p6 = por %p134_p3, %p52_p0  ;;  %p141_p7 = scmp.lt.s32.totalorder %s1239_s17, 3 }
   0xd   : > { %s1571_s22 = scalar_select %p1313_p4, 1, 0 }
   0xe   : > { %s1572_s23 = scalar_select %p1318_p6, 1, 0 }
   0xf   : > { %p1323_p8 = pnand %p745_p5, %p141_p7  ;;  %s1241_s25 = smov [#allocation6]  }
  0x10   : > { %s155_s26 = sshll.u32 %s1241_s25, 4  ;;  %s1242_s28 = smov [#allocation8]   ;;  %s1327_s26 = int_to_ptr.vmem [resolvable:$true] %s155_s26 }
  0x11   : > { %p976_p9 = pneg %p1323_p8  ;;  %s171_s29 = sshll.u32 %s1242_s28, 4  ;;  %s1338_s29 = int_to_ptr.vmem [resolvable:$true] %s171_s29 }
  0x12   : > { %s1067_s5 = scalar_lea.hbm %s1562_s1, 2048 }
  0x13   : > { %p1334_p11 = pnand %p976_p9, %p1303_p1  ;;  %p1068_p12 = scmp.ne.s32.totalorder %s1562_s1, %s1067_s5 }
  0x14   : > { %p1074_p5 = scmp.lt.u32.totalorder %s1067_s5, %s1562_s1 }
  0x15   : > { %p1069_p13 = pneg %p1334_p11 }
  0x17   : > { %p1070_p0 = pnand %p1069_p13, %p1068_p12 }
  0x19   : > { %p1071_p3 = pneg %p1070_p0 }
  0x1b   : > { %p1076_p7 = pnand %p1074_p5, %p1071_p3 }
  0x1d   : > { %1079 = shalt.err (!%p1076_p7)
}
  0x1e   : > { %s1080_s10 = scalar_lea.vmem %s1327_s26, 2048  ;;  %p1088_p1 = scmp.lt.s32.totalorder %s1327_s26, %s1327_s26 }
  0x1f   : > { %p1081_p9 = scmp.ne.s32.totalorder %s1327_s26, %s1080_s10  ;;  %p1089_p12 = scmp.lt.s32.totalorder %s1080_s10, %s1080_s10 }
  0x21   : > { %p1083_p10 = pnand %p1081_p9, %p1069_p13  ;;  %p1090_p0 = por %p1089_p12, %p1088_p1 }
  0x23   : > { %p1084_p6 = pneg %p1083_p10 }
  0x25   : > { %p1091_p4 = pnand %p1090_p0, %p1084_p6 }
  0x27   : > { %1094 = shalt.err (!%p1091_p4)
}
  0x28   : > { %s1243_s11 = smov 128   ;;  %s1244_s18 = smov 8  }
  0x29   : > { %979 = dma.hbm_to_vmem [thread:$0]  (!%p1334_p11), %s1562_s1, 2048, %s1327_s26, [#allocation7], %s1243_s11, %s1243_s11, %s1244_s18  }
  0x2a   : > { %s1095_s4 = scalar_lea.hbm %s1563_s2, 2048 }
  0x2b   : > { %p1096_p1 = scmp.ne.s32.totalorder %s1563_s2, %s1095_s4  ;;  %p1102_p10 = scmp.lt.u32.totalorder %s1095_s4, %s1563_s2 }
  0x2d   : > { %p1098_p4 = pnand %p1096_p1, %p1069_p13 }
  0x2f   : > { %p1099_p6 = pneg %p1098_p4 }
  0x31   : > { %p1104_p3 = pnand %p1102_p10, %p1099_p6 }
  0x33   : > { %1107 = shalt.err (!%p1104_p3)
}
  0x34   : > { %s1108_s26 = scalar_lea.vmem %s1338_s29, 2048  ;;  %p1116_p12 = scmp.lt.s32.totalorder %s1338_s29, %s1338_s29 }
  0x35   : > { %p1109_p5 = scmp.ne.s32.totalorder %s1338_s29, %s1108_s26  ;;  %p1117_p0 = scmp.lt.s32.totalorder %s1108_s26, %s1108_s26 }
  0x37   : > { %p1111_p7 = pnand %p1109_p5, %p1069_p13  ;;  %p1118_p1 = por %p1117_p0, %p1116_p12 }
  0x39   : > { %p1112_p9 = pneg %p1111_p7 }
  0x3b   : > { %p1119_p4 = pnand %p1118_p1, %p1112_p9 }
  0x3d   : > { %1122 = shalt.err (!%p1119_p4)
}
  0x3e   : > { %982 = dma.hbm_to_vmem [thread:$0]  (!%p1334_p11), %s1563_s2, 2048, %s1338_s29, [#allocation7], %s1243_s11, %s1243_s11, %s1244_s18  }
  0x3f   : > { %s32_s27 = sadd.s32 1, %s1235_s16  ;;  %s39_s19 = sadd.s32 1, %s1227_s14 }
  0x40   : > { %p34_p13 = scmp.ge.s32.totalorder %s32_s27, 2  ;;  %p46_p6 = scmp.ne.s32.totalorder %s1227_s14, %s1223_s13 }
  0x41   : > { %p47_p10 = scmp.eq.s32.totalorder %s1239_s17, 0  ;;  %p993_p3 = scmp.lt.s32.totalorder %s1239_s17, 2 }
  0x42   : > { %s1588_s27 = smov (%p34_p13, %s32_s27), 0  ;;  %p1408_p7 = por %p1307_p2, %p46_p6 }
  0x43   : > { %p48_p5 = por %p47_p10, %p46_p6  ;;  %s36_s28 = ssub.s32 %s1235_s16, %s1588_s27 }
  0x44   : > { %s1575_s25 = scalar_select %p1408_p7, 1, 0 }
  0x45   : > { %s185_s30 = sand.u32 1, %s1227_s14   ;;  %p37_p9 = scmp.eq.s32.totalorder %s36_s28, 0 }
  0x46   : > { %s749_s29 = sshll.u32 %s185_s30, 6  ;;  %s762_s4 = sshll.u32 %s1235_s16, 10 }
  0x47   : > { %s1417_s5 = scalar_select %p37_p9, %s1227_s14, %s39_s19  }
  0x48   : > { %s1422_s8 = scalar_lea.hbm %s1561_s0, %s762_s4  ;;  %s189_s21 = scalar_lea.vmem [#allocation3], %s749_s29 }
  0x49   : > { %s196_s26 = sshll.u32 %s189_s21, 4  ;;  %p1426_p2 = pnand %p993_p3, %p48_p5  ;;  %s1430_s26 = int_to_ptr.vmem [resolvable:$true] %s196_s26 }
  0x4a   : > { %s1432_s10 = scalar_lea.sflag [#allocation4], %s185_s30  ;;  %s1123_s19 = scalar_lea.hbm %s1422_s8, 1024 }
  0x4b   : > { %p1124_p11 = scmp.ne.s32.totalorder %s1422_s8, %s1123_s19  ;;  %p1125_p12 = pneg %p1426_p2 }
  0x4c   : > { %s1128_s4 = scalar_lea.hbm %s1561_s0, 2048  ;;  %p1129_p4 = scmp.lt.u32.totalorder %s1422_s8, %s1561_s0 }
  0x4d   : > { %p1126_p0 = pnand %p1125_p12, %p1124_p11  ;;  %p1130_p13 = scmp.lt.u32.totalorder %s1128_s4, %s1123_s19 }
  0x4e   : > { %p1132_p10 = scmp.lt.u32.totalorder %s1123_s19, %s1422_s8 }
  0x4f   : > { %p1127_p1 = pneg %p1126_p0  ;;  %p1131_p6 = por %p1130_p13, %p1129_p4 }
  0x51   : > { %p1133_p3 = por %p1132_p10, %p1131_p6 }
  0x53   : > { %p1134_p5 = pnand %p1133_p3, %p1127_p1 }
  0x55   : > { %1137 = shalt.err (!%p1134_p5)
}
  0x56   : > { %s1138_s30 = scalar_lea.vmem %s1430_s26, 1024  ;;  %s1245_s21 = smov [#allocation3]  }
  0x57   : > { %p1139_p9 = scmp.ne.s32.totalorder %s1430_s26, %s1138_s30  ;;  %s1143_s28 = sshll.u32 %s1245_s21, 4  ;;  %s1144_s28 = int_to_ptr.vmem [resolvable:$false] %s1143_s28 }
  0x58   : > { %s1145_s29 = scalar_lea.vmem %s1144_s28, 2048  ;;  %p1146_p7 = scmp.lt.s32.totalorder %s1430_s26, %s1144_s28 }
  0x59   : > { %p1141_p11 = pnand %p1139_p9, %p1125_p12  ;;  %p1147_p4 = scmp.lt.s32.totalorder %s1145_s29, %s1138_s30 }
  0x5b   : > { %p1142_p0 = pneg %p1141_p11  ;;  %p1148_p13 = por %p1147_p4, %p1146_p7 }
  0x5d   : > { %p1149_p6 = pnand %p1148_p13, %p1142_p0 }
  0x5f   : > { %1152 = shalt.err (!%p1149_p6)
}
  0x60   : > { %986 = dma.hbm_to_vmem [thread:$0]  (!%p1426_p2), %s1422_s8, 1024, %s1430_s26, %s1432_s10, %s1243_s11, %s1243_s11, %s1244_s18  }
  0x61   : > { %208 = sbr.rel (%p1323_p8) target bundleno = 622 (0x26e), region = 32  ;;  %s1466_s19 = sand.u32 (!%p1323_p8), 1, %s1223_s13  }
  0x62   : > { %s753_s4 = sshll.u32 (!%p1323_p8), %s1466_s19, 6  ;;  %s211_s6 = scalar_lea.sflag (!%p1323_p8), [#allocation4], %s1466_s19 }
  0x63   : > { %s1472_s9 = scalar_lea.vmem (!%p1323_p8), [#allocation3], %s753_s4  ;;  %p1577_p7 = scmp.ne.s32.totalorder (!%p1323_p8), %s1571_s22, 0 }
  0x68   : > { %1206 = dma.done.wait (%p1577_p7), %s211_s6, 1024  }
  0x69   : > { %1208 = vsyncadd (%p1577_p7), %s211_s6, 4294966272  ;;  %p1578_p2 = scmp.ne.s32.totalorder %s1569_s20, 0 }
  0x6b   : > { %1210 = dma.done.wait (%p1578_p2), [#allocation7], 4096  }
  0x6c   : > { %1212 = vsyncadd (%p1578_p2), [#allocation7], 4294963200  ;;  %v268_v0 = vld [vmem:[#allocation6] sm:$0xff]  ;;  %v269_v1 = vld [vmem:[#allocation6 + $0x8] sm:$0xff]  ;;  %s244_s20 = scalar_lea.vmem [#allocation9], %s753_s4  ;;  %s763_s24 = sshll.u32 %s1231_s15, 10 }
  0x6d   : > { %v270_v2 = vld [vmem:[#allocation6 + $0x10] sm:$0xff]  ;;  %v900_v3 = vpack.c.bf16 %v269_v1, %v268_v0  ;;  %v271_v4 = vld [vmem:[#allocation6 + $0x18] sm:$0xff]  ;;  %v272_v6 = vld [vmem:[#allocation6 + $0x20] sm:$0xff]  ;;  %s639_s22 = sshll.u32 %s244_s20, 4  ;;  %s1512_s8 = scalar_lea.hbm %s1564_s3, %s763_s24  ;;  %s1507_s22 = int_to_ptr.vmem [resolvable:$true] %s639_s22 }
  0x6e   : > { %v904_v5 = vpack.c.bf16 %v271_v4, %v270_v2  ;;  %v273_v7 = vld [vmem:[#allocation6 + $0x28] sm:$0xff]  ;;  %v260_v9 = vld [vmem:[%s1472_s9] sm:$0xff]  ;;  %v274_v10 = vld [vmem:[#allocation6 + $0x30] sm:$0xff]  ;;  %s626_s26 = scalar_lea.sflag [#allocation5], %s1466_s19  ;;  %s1153_s10 = scalar_lea.vmem %s1507_s22, 1024 }
  0x6f   : > { %901 = vmatprep.subr.bf16.mxu0 %v900_v3  ;;  %v908_v8 = vpack.c.bf16 %v273_v7, %v272_v6  ;;  %v275_v11 = vld [vmem:[#allocation6 + $0x38] sm:$0xff]  ;;  %844 = vmatprep.mubr.f32.mxu0 %v260_v9  ;;  %v469_v12 = vld [vmem:[#allocation8] sm:$0xff]  ;;  %v470_v13 = vld [vmem:[#allocation8 + $0x8] sm:$0xff]  ;;  %p1154_p8 = scmp.ne.s32.totalorder %s1507_s22, %s1153_s10  ;;  %p1579_p12 = scmp.ne.s32.totalorder %s1575_s25, 0 }
  0x70   : > { %903 = vmatpush3.bf16.msra.mxu0 %v900_v3  ;;  %v912_v14 = vpack.c.bf16 %v275_v11, %v274_v10  ;;  %v932_v15 = vpack.c.bf16 %v470_v13, %v469_v12  ;;  %v276_v16 = vld [vmem:[#allocation6 + $0x40] sm:$0xff]  ;;  %v277_v17 = vld [vmem:[#allocation6 + $0x48] sm:$0xff]  ;;  %v278_v19 = vld [vmem:[#allocation6 + $0x50] sm:$0xff]  ;;  %s1246_s15 = smov [#allocation9]  }
  0x71   : > { %905 = vmatprep.subr.bf16.mxu0 %v904_v5  ;;  %v916_v18 = vpack.c.bf16 %v277_v17, %v276_v16  ;;  %v279_v20 = vld [vmem:[#allocation6 + $0x58] sm:$0xff]  ;;  %v280_v22 = vld [vmem:[#allocation6 + $0x60] sm:$0xff]  ;;  %v281_v23 = vld [vmem:[#allocation6 + $0x68] sm:$0xff]  ;;  %p1155_p1 = pnand %p1154_p8, %p1579_p12  ;;  %s1157_s7 = sshll.u32 %s1246_s15, 4  ;;  %s1158_s7 = int_to_ptr.vmem [resolvable:$false] %s1157_s7 }
  0x72   : > { %933 = vmatprep.subr.bf16.mxu1 %v932_v15  ;;  %v920_v21 = vpack.c.bf16 %v279_v20, %v278_v19  ;;  %v924_v24 = vpack.c.bf16 %v281_v23, %v280_v22  ;;  %v282_v25 = vld [vmem:[#allocation6 + $0x70] sm:$0xff]  ;;  %v283_v26 = vld [vmem:[#allocation6 + $0x78] sm:$0xff]  ;;  %v261_v28 = vld [vmem:[%s1472_s9 + $0x8] sm:$0xff]  ;;  %s1159_s30 = scalar_lea.vmem %s1158_s7, 2048  ;;  %p1160_p3 = scmp.lt.s32.totalorder %s1507_s22, %s1158_s7 }
  0x73   : > { %935 = vmatpush3.bf16.msra.mxu1 %v932_v15  ;;  %v928_v27 = vpack.c.bf16 %v283_v26, %v282_v25  ;;  %v262_v29 = vld [vmem:[%s1472_s9 + $0x10] sm:$0xff]  ;;  %v263_v30 = vld [vmem:[%s1472_s9 + $0x18] sm:$0xff]  ;;  %v264_v31 = vld [vmem:[%s1472_s9 + $0x20] sm:$0xff]  ;;  %p1156_p10 = pneg %p1155_p1  ;;  %p1161_p5 = scmp.lt.s32.totalorder %s1159_s30, %s1153_s10 }
  0x74   : > { %907 = vmatpush3.bf16.msra.mxu0 %v904_v5  ;;  %v265_v32 = vld [vmem:[%s1472_s9 + $0x28] sm:$0xff]  ;;  %v266_v33 = vld [vmem:[%s1472_s9 + $0x30] sm:$0xff]  ;;  %v267_v34 = vld [vmem:[%s1472_s9 + $0x38] sm:$0xff] }
  0x75   : > { %909 = vmatprep.subr.bf16.mxu0 %v908_v8  ;;  %v471_v35 = vld [vmem:[#allocation8 + $0x10] sm:$0xff]  ;;  %v472_v36 = vld [vmem:[#allocation8 + $0x18] sm:$0xff]  ;;  %v473_v38 = vld [vmem:[#allocation8 + $0x20] sm:$0xff]  ;;  %p1162_p9 = por %p1161_p5, %p1160_p3 }
  0x76   : > { %v936_v37 = vpack.c.bf16 %v472_v36, %v471_v35  ;;  %v474_v39 = vld [vmem:[#allocation8 + $0x28] sm:$0xff]  ;;  %v475_v41 = vld [vmem:[#allocation8 + $0x30] sm:$0xff]  ;;  %v476_v42 = vld [vmem:[#allocation8 + $0x38] sm:$0xff] }
  0x77   : > { %v940_v40 = vpack.c.bf16 %v474_v39, %v473_v38  ;;  %v944_v43 = vpack.c.bf16 %v476_v42, %v475_v41  ;;  %v477_v44 = vld [vmem:[#allocation8 + $0x40] sm:$0xff]  ;;  %v478_v45 = vld [vmem:[#allocation8 + $0x48] sm:$0xff]  ;;  %v479_v47 = vld [vmem:[#allocation8 + $0x50] sm:$0xff]  ;;  %p1163_p11 = pnand %p1162_p9, %p1156_p10 }
  0x78   : > { %911 = vmatpush3.bf16.msra.mxu0 %v908_v8  ;;  %937 = vmatprep.subr.bf16.mxu1 %v936_v37  ;;  %v948_v46 = vpack.c.bf16 %v478_v45, %v477_v44  ;;  %v480_v48 = vld [vmem:[#allocation8 + $0x58] sm:$0xff]  ;;  %v481_v50 = vld [vmem:[#allocation8 + $0x60] sm:$0xff]  ;;  %v482_v51 = vld [vmem:[#allocation8 + $0x68] sm:$0xff] }
  0x79   : > { %913 = vmatprep.subr.bf16.mxu0 %v912_v14  ;;  %939 = vmatpush3.bf16.msra.mxu1 %v936_v37  ;;  %v952_v49 = vpack.c.bf16 %v480_v48, %v479_v47  ;;  %v956_v52 = vpack.c.bf16 %v482_v51, %v481_v50  ;;  %v483_v53 = vld [vmem:[#allocation8 + $0x70] sm:$0xff]  ;;  %v484_v54 = vld [vmem:[#allocation8 + $0x78] sm:$0xff] }
  0x7a   : > { %941 = vmatprep.subr.bf16.mxu1 %v940_v40  ;;  %v960_v55 = vpack.c.bf16 %v484_v54, %v483_v53 }
  0x7c   : > { %915 = vmatpush3.bf16.msra.mxu0 %v912_v14 }
  0x7d   : > { %917 = vmatprep.subr.bf16.mxu0 %v916_v18  ;;  %943 = vmatpush3.bf16.msra.mxu1 %v940_v40 }
  0x7e   : > { %945 = vmatprep.subr.bf16.mxu1 %v944_v43 }
  0x80   : > { %919 = vmatpush3.bf16.msra.mxu0 %v916_v18 }
  0x81   : > { %921 = vmatprep.subr.bf16.mxu0 %v920_v21  ;;  %947 = vmatpush3.bf16.msra.mxu1 %v944_v43 }
  0x82   : > { %949 = vmatprep.subr.bf16.mxu1 %v948_v46 }
  0x84   : > { %923 = vmatpush3.bf16.msra.mxu0 %v920_v21 }
  0x85   : > { %925 = vmatprep.subr.bf16.mxu0 %v924_v24  ;;  %951 = vmatpush3.bf16.msra.mxu1 %v948_v46 }
  0x86   : > { %953 = vmatprep.subr.bf16.mxu1 %v952_v49 }
  0x88   : > { %927 = vmatpush3.bf16.msra.mxu0 %v924_v24 }
  0x89   : > { %929 = vmatprep.subr.bf16.mxu0 %v928_v27  ;;  %955 = vmatpush3.bf16.msra.mxu1 %v952_v49 }
  0x8a   : > { %957 = vmatprep.subr.bf16.mxu1 %v956_v52 }
  0x8c   : > { %931 = vmatpush3.bf16.msra.mxu0 %v928_v27 }
  0x8d   : > { %959 = vmatpush3.bf16.msra.mxu1 %v956_v52 }
  0x8e   : > { %961 = vmatprep.subr.bf16.mxu1 %v960_v55 }
  0x8f   : > { %845 = vmatmul.mubr.f32.vlgmr.msra.gmra.mrb[0].mxu0 %v261_v28 }
  0x90   : > { %847 = vmatprep.mubr.f32.mxu0 %v262_v29 }
  0x91   : > { %963 = vmatpush3.bf16.msra.mxu1 %v960_v55 }
  0x93   : > { %848 = vmatmul.mubr.f32.gmra.mrb[2].mxu0 %v263_v30 }
  0x94   : > { %850 = vmatprep.mubr.f32.mxu0 %v264_v31 }
  0x97   : > { %851 = vmatmul.mubr.f32.gmra.mrb[4].mxu0 %v265_v32 }
  0x98   : > { %853 = vmatprep.mubr.f32.mxu0 %v266_v33 }
  0x9b   : > { %854 = vmatmul.mubr.f32.gmra.mrb[6].mxu0 %v267_v34 }
 0x162   : > { %v846_v56 = vpop.f32.mrb[0].mxu0 }
 0x163   : > { %v398_v57 = vmul.f32 %v846_v56, %v846_v56  ;;  %v350_v58 = vpop.f32.mrb[1].mxu0  ;;  %v390_v45 = vmul.f32 0.5, %v846_v56 }
 0x164   : > { %v397_v59 = vmul.f32 %v350_v58, %v350_v58  ;;  %v389_v43 = vmul.f32 0.5, %v350_v58 }
 0x165   : > { %v406_v60 = vmul.f32 %v846_v56, %v398_v57 }
 0x166   : > { %v405_v61 = vmul.f32 %v397_v59, %v350_v58  ;;  %v1490_v62 = vpop.f32.mrb[2].mxu0 }
 0x167   : > { %v414_v63 = vmul.f32 0.044715, %v406_v60  ;;  %v400_v0 = vmul.f32 %v1490_v62, %v1490_v62  ;;  %v360_v1 = vpop.f32.mrb[3].mxu0  ;;  %v392_v53 = vmul.f32 0.5, %v1490_v62 }
 0x168   : > { %v413_v2 = vmul.f32 0.044715, %v405_v61  ;;  %v399_v3 = vmul.f32 %v360_v1, %v360_v1  ;;  %v391_v51 = vmul.f32 0.5, %v360_v1 }
 0x169   : > { %v422_v4 = vadd.f32 %v846_v56, %v414_v63  ;;  %v408_v5 = vmul.f32 %v1490_v62, %v400_v0 }
 0x16a   : > { %v407_v6 = vmul.f32 %v399_v3, %v360_v1  ;;  %v1495_v7 = vpop.f32.mrb[4].mxu0  ;;  %v421_v8 = vadd.f32 %v413_v2, %v350_v58 }
 0x16b   : > { %v430_v9 = vmul.f32 0.7978846, %v422_v4  ;;  %v416_v10 = vmul.f32 0.044715, %v408_v5  ;;  %v402_v11 = vmul.f32 %v1495_v7, %v1495_v7  ;;  %v370_v12 = vpop.f32.mrb[5].mxu0  ;;  %v394_v61 = vmul.f32 0.5, %v1495_v7 }
 0x16c   : > { %v415_v13 = vmul.f32 0.044715, %v407_v6  ;;  %v401_v14 = vmul.f32 %v370_v12, %v370_v12  ;;  %v429_v15 = vmul.f32 0.7978846, %v421_v8  ;;  %v393_v58 = vmul.f32 0.5, %v370_v12 }
 0x16d   : > { %1051 = vtanh.f32 %v430_v9  ;;  %v424_v16 = vadd.f32 %v1490_v62, %v416_v10  ;;  %v410_v17 = vmul.f32 %v1495_v7, %v402_v11 }
 0x16e   : > { %v423_v18 = vadd.f32 %v415_v13, %v360_v1  ;;  %v409_v19 = vmul.f32 %v401_v14, %v370_v12  ;;  %v855_v20 = vpop.f32.mrb[6].mxu0  ;;  %1053 = vtanh.f32 %v429_v15 }
 0x16f   : > { %v432_v21 = vmul.f32 0.7978846, %v424_v16  ;;  %v418_v22 = vmul.f32 0.044715, %v410_v17  ;;  %v404_v23 = vmul.f32 %v855_v20, %v855_v20  ;;  %v380_v24 = vpop.f32.mrb[7].mxu0  ;;  %v396_v5 = vmul.f32 0.5, %v855_v20 }
 0x170   : > { %v431_v25 = vmul.f32 0.7978846, %v423_v18  ;;  %v417_v26 = vmul.f32 0.044715, %v409_v19  ;;  %v403_v27 = vmul.f32 %v380_v24, %v380_v24  ;;  %v395_v4 = vmul.f32 0.5, %v380_v24 }
 0x171   : > { %1055 = vtanh.f32 %v432_v21  ;;  %v426_v28 = vadd.f32 %v1495_v7, %v418_v22  ;;  %v412_v29 = vmul.f32 %v855_v20, %v404_v23 }
 0x172   : > { %1057 = vtanh.f32 %v431_v25  ;;  %v425_v30 = vadd.f32 %v417_v26, %v370_v12  ;;  %v411_v31 = vmul.f32 %v403_v27, %v380_v24 }
 0x173   : > { %v434_v32 = vmul.f32 0.7978846, %v426_v28  ;;  %v420_v33 = vmul.f32 0.044715, %v412_v29 }
 0x174   : > { %v433_v34 = vmul.f32 0.7978846, %v425_v30  ;;  %v419_v35 = vmul.f32 0.044715, %v411_v31 }
 0x175   : > { %1059 = vtanh.f32 %v434_v32  ;;  %v428_v36 = vadd.f32 %v855_v20, %v420_v33 }
 0x176   : > { %1061 = vtanh.f32 %v433_v34  ;;  %v427_v37 = vadd.f32 %v419_v35, %v380_v24 }
 0x177   : > { %v1052_v38 = vpop.eup %1051  ;;  %v436_v39 = vmul.f32 0.7978846, %v428_v36 }
 0x178   : > { %v1054_v40 = vpop.eup %1053  ;;  %v435_v41 = vmul.f32 0.7978846, %v427_v37  ;;  %v446_v42 = vadd.f32 1.0, %v1052_v38 }
 0x179   : > { %1063 = vtanh.f32 %v436_v39  ;;  %v445_v44 = vadd.f32 1.0, %v1054_v40 }
 0x17a   : > { %1065 = vtanh.f32 %v435_v41  ;;  %v454_v49 = vmul.f32 %v446_v42, %v390_v45 }
 0x17b   : > { %v1056_v46 = vpop.eup %1055  ;;  %v453_v47 = vmul.f32 %v445_v44, %v389_v43 }
 0x17c   : > { %v1058_v48 = vpop.eup %1057  ;;  %v448_v50 = vadd.f32 1.0, %v1056_v46 }
 0x17d   : > { %888 = vmatprep.mubr.f32.mxu1 %v453_v47  ;;  %v447_v52 = vadd.f32 1.0, %v1058_v48 }
 0x17e   : > { %889 = vmatmul.mubr.f32.vlgmr.msra.gmra.mrb[0].mxu1 %v454_v49  ;;  %v456_v59 = vmul.f32 %v448_v50, %v392_v53 }
 0x17f   : > { %v1060_v54 = vpop.eup %1059  ;;  %v455_v55 = vmul.f32 %v447_v52, %v391_v51 }
 0x180   : > { %v1062_v57 = vpop.eup %1061  ;;  %v450_v60 = vadd.f32 1.0, %v1060_v54 }
 0x181   : > { %891 = vmatprep.mubr.f32.mxu1 %v455_v55  ;;  %v449_v56 = vadd.f32 1.0, %v1062_v57 }
 0x182   : > { %892 = vmatmul.mubr.f32.gmra.mrb[2].mxu1 %v456_v59  ;;  %v458_v2 = vmul.f32 %v450_v60, %v394_v61 }
 0x183   : > { %v1064_v63 = vpop.eup %1063  ;;  %v457_v0 = vmul.f32 %v449_v56, %v393_v58 }
 0x184   : > { %v1066_v1 = vpop.eup %1065  ;;  %v452_v3 = vadd.f32 1.0, %v1064_v63 }
 0x185   : > { %894 = vmatprep.mubr.f32.mxu1 %v457_v0  ;;  %v451_v62 = vadd.f32 1.0, %v1066_v1 }
 0x186   : > { %895 = vmatmul.mubr.f32.gmra.mrb[4].mxu1 %v458_v2  ;;  %v460_v8 = vmul.f32 %v452_v3, %v396_v5 }
 0x187   : > { %v459_v6 = vmul.f32 %v451_v62, %v395_v4 }
 0x189   : > { %897 = vmatprep.mubr.f32.mxu1 %v459_v6 }
 0x18a   : > { %898 = vmatmul.mubr.f32.gmra.mrb[6].mxu1 %v460_v8 }
 0x251   : > { %v890_v9 = vpop.f32.mrb[0].mxu1 }
 0x252   : > { %618 = vst [vmem:[%s244_s20 + $0x8] sm:$0xff] %v890_v9  ;;  %v551_v7 = vpop.f32.mrb[1].mxu1 }
 0x253   : > { %617 = vst [vmem:[%s244_s20] sm:$0xff] %v551_v7 }
 0x255   : > { %v893_v10 = vpop.f32.mrb[2].mxu1 }
 0x256   : > { %620 = vst [vmem:[%s244_s20 + $0x18] sm:$0xff] %v893_v10  ;;  %v561_v11 = vpop.f32.mrb[3].mxu1 }
 0x257   : > { %619 = vst [vmem:[%s244_s20 + $0x10] sm:$0xff] %v561_v11 }
 0x259   : > { %v896_v12 = vpop.f32.mrb[4].mxu1 }
 0x25a   : > { %622 = vst [vmem:[%s244_s20 + $0x28] sm:$0xff] %v896_v12  ;;  %v571_v13 = vpop.f32.mrb[5].mxu1 }
 0x25b   : > { %621 = vst [vmem:[%s244_s20 + $0x20] sm:$0xff] %v571_v13 }
 0x25d   : > { %v899_v14 = vpop.f32.mrb[6].mxu1 }
 0x25e   : > { %624 = vst [vmem:[%s244_s20 + $0x38] sm:$0xff] %v899_v14  ;;  %v581_v15 = vpop.f32.mrb[7].mxu1 }
 0x25f   : > { %623 = vst [vmem:[%s244_s20 + $0x30] sm:$0xff] %v581_v15 }
 0x260   : > { %1166 = shalt.err (!%p1163_p11)
}
 0x261   : > { %s1167_s21 = scalar_lea.hbm %s1512_s8, 1024  ;;  %s1171_s4 = scalar_lea.hbm %s1564_s3, 2048 }
 0x262   : > { %p1168_p0 = scmp.ne.s32.totalorder %s1512_s8, %s1167_s21  ;;  %p1172_p6 = scmp.lt.u32.totalorder %s1512_s8, %s1564_s3 }
 0x263   : > { %p1173_p7 = scmp.lt.u32.totalorder %s1171_s4, %s1167_s21  ;;  %p1175_p8 = scmp.lt.u32.totalorder %s1167_s21, %s1512_s8 }
 0x264   : > { %p1169_p4 = pnand %p1168_p0, %p1579_p12 }
 0x265   : > { %p1174_p2 = por %p1173_p7, %p1172_p6 }
 0x266   : > { %p1170_p13 = pneg %p1169_p4 }
 0x267   : > { %p1176_p1 = por %p1175_p8, %p1174_p2 }
 0x269   : > { %p1177_p10 = pnand %p1176_p1, %p1170_p13 }
 0x26b   : > { %1180 = shalt.err (!%p1177_p10)
}
 0x26c   : > { %s1247_s20 = smov 128   ;;  %s1248_s24 = smov 8  }
 0x26d   : > { %974 = dma.vmem_to_hbm [thread:$0]  (%p1579_p12), %s1507_s22, 1024, %s1512_s8, %s626_s26, %s1247_s20, %s1247_s20, %s1248_s24  }
 0x26e PF: > { %s654_s11 = sand.u32 1, %s1219_s12   ;;  %p1580_p3 = scmp.ne.s32.totalorder %s1572_s23, 0 }
 0x26f   : > { %p1581_p5 = scmp.ge.s32.totalorder %s1239_s17, 2  ;;  %s655_s18 = scalar_lea.sflag [#allocation5], %s654_s11 }
 0x271   : > { %p988_p9 = pnand %p1581_p5, %p1580_p3 }
 0x273   : > { %1214 = dma.done.wait (!%p988_p9), %s655_s18, 1024  }
 0x274   : > { %1216 = vsyncadd (!%p988_p9), %s655_s18, 4294966272  ;;  %s20_s17 = sadd.s32 1, %s1239_s17   ;;  %s1582_s12 = smov %s1223_s13 }
 0x275   : > { %p17_p11 = scmp.ge.s32.totalorder %s20_s17, 4   ;;  %s1583_s13 = smov %s1227_s14 }
 0x276   : > { %s1584_s14 = smov %s1417_s5  ;;  %s1585_s15 = smov %s1235_s16 }
 0x277   : > { %s1586_s16 = smov %s1588_s27  ;;  %19 = sbr.rel (!%p17_p11) target bundleno = 7 (0x7), region = 95 }
 0x27e   :  { %660 = vsyncpa [#allocation4], 1 }
 0x27f   :  { %662 = vsyncpa [#allocation4 + $0x1], 1 }
 0x280   :  { %663 = vsyncpa [#allocation7], 1 }
 0x281   :  { %664 = vsyncpa [#allocation5], 1 }
 0x282   :  { %666 = vsyncpa [#allocation5 + $0x1], 1 }

// kernel: tpu_custom_call.1
= control target key start
LH: loop header
LB: loop body
LE: loop exit
PB: predicated region body
PF: predicated region fallthrough
CT: control target
= control target key end

     0   :  { %8 = vsyncpa [#allocation4], 0  ;;  %s1561_s0 = inlined_call_operand.hbm [shape: f32[128,128], index: 0, kind: input, shape index: {}]   ;;  %s1562_s1 = inlined_call_operand.hbm [shape: f32[128,128], index: 1, kind: input, shape index: {}]   ;;  %s1563_s2 = inlined_call_operand.hbm [shape: f32[128,128], index: 2, kind: input, shape index: {}]   ;;  %s1564_s3 = inlined_call_operand.hbm [shape: f32[128,128], index: 3, kind: output, shape index: {}]  }
   0x1   :  { %10 = vsyncpa [#allocation4 + $0x1], 0 }
   0x2   :  { %11 = vsyncpa [#allocation7], 0 }
   0x3   :  { %12 = vsyncpa [#allocation5], 0 }
   0x4   :  { %14 = vsyncpa [#allocation5 + $0x1], 0  ;;  %s1269_s12 = smov 0   ;;  %s1271_s13 = smov 0  }
   0x5   :  { %s1273_s14 = smov 0   ;;  %s1275_s15 = smov 0  }
   0x6   :  { %s1277_s16 = smov 0   ;;  %s1279_s17 = smov 0  }
   0x7 LB: > { %s743_s18 = sadd.s32 4294967295, %s1239_s17   ;;  %s744_s19 = sadd.s32 4294967294, %s1239_s17   ;;  %s1239_s17 = sphi %s1279_s17, %s20_s17   ;;  %s1235_s16 = sphi %s1277_s16, %s1586_s16   ;;  %s1231_s15 = sphi %s1275_s15, %s1585_s15   ;;  %s1227_s14 = sphi %s1273_s14, %s1584_s14   ;;  %s1223_s13 = sphi %s1271_s13, %s1583_s13   ;;  %s1219_s12 = sphi %s1269_s12, %s1582_s12  }
   0x8   : > { %p52_p0 = scmp.ne.s32.totalorder %s1223_s13, %s1219_s12  ;;  %p1303_p1 = scmp.eq.s32.totalorder %s743_s18, 0 }
   0x9   : > { %p1307_p2 = scmp.eq.s32.totalorder %s743_s18, 1  ;;  %p134_p3 = scmp.eq.s32.totalorder %s744_s19, 1 }
   0xa   : > { %s1569_s20 = scalar_select %p1303_p1, 1, 0 }
   0xb   : > { %p1313_p4 = por %p1303_p1, %p52_p0  ;;  %p745_p5 = scmp.ge.s32.totalorder %s1239_s17, 1 }
   0xc   : > { %p1318_p6 = por %p134_p3, %p52_p0  ;;  %p141_p7 = scmp.lt.s32.totalorder %s1239_s17, 3 }
   0xd   : > { %s1571_s22 = scalar_select %p1313_p4, 1, 0 }
   0xe   : > { %s1572_s23 = scalar_select %p1318_p6, 1, 0 }
   0xf   : > { %p1323_p8 = pnand %p745_p5, %p141_p7  ;;  %s1241_s25 = smov [#allocation6]  }
  0x10   : > { %s155_s26 = sshll.u32 %s1241_s25, 4  ;;  %s1242_s28 = smov [#allocation8]   ;;  %s1327_s26 = int_to_ptr.vmem [resolvable:$true] %s155_s26 }
  0x11   : > { %p976_p9 = pneg %p1323_p8  ;;  %s171_s29 = sshll.u32 %s1242_s28, 4  ;;  %s1338_s29 = int_to_ptr.vmem [resolvable:$true] %s171_s29 }
  0x12   : > { %s1067_s5 = scalar_lea.hbm %s1562_s1, 2048 }
  0x13   : > { %p1334_p11 = pnand %p976_p9, %p1303_p1  ;;  %p1068_p12 = scmp.ne.s32.totalorder %s1562_s1, %s1067_s5 }
  0x14   : > { %p1074_p5 = scmp.lt.u32.totalorder %s1067_s5, %s1562_s1 }
  0x15   : > { %p1069_p13 = pneg %p1334_p11 }
  0x17   : > { %p1070_p0 = pnand %p1069_p13, %p1068_p12 }
  0x19   : > { %p1071_p3 = pneg %p1070_p0 }
  0x1b   : > { %p1076_p7 = pnand %p1074_p5, %p1071_p3 }
  0x1d   : > { %1079 = shalt.err (!%p1076_p7)
}
  0x1e   : > { %s1080_s10 = scalar_lea.vmem %s1327_s26, 2048  ;;  %p1088_p1 = scmp.lt.s32.totalorder %s1327_s26, %s1327_s26 }
  0x1f   : > { %p1081_p9 = scmp.ne.s32.totalorder %s1327_s26, %s1080_s10  ;;  %p1089_p12 = scmp.lt.s32.totalorder %s1080_s10, %s1080_s10 }
  0x21   : > { %p1083_p10 = pnand %p1081_p9, %p1069_p13  ;;  %p1090_p0 = por %p1089_p12, %p1088_p1 }
  0x23   : > { %p1084_p6 = pneg %p1083_p10 }
  0x25   : > { %p1091_p4 = pnand %p1090_p0, %p1084_p6 }
  0x27   : > { %1094 = shalt.err (!%p1091_p4)
}
  0x28   : > { %s1243_s11 = smov 128   ;;  %s1244_s18 = smov 8  }
  0x29   : > { %979 = dma.hbm_to_vmem [thread:$0]  (!%p1334_p11), %s1562_s1, 2048, %s1327_s26, [#allocation7], %s1243_s11, %s1243_s11, %s1244_s18  }
  0x2a   : > { %s1095_s4 = scalar_lea.hbm %s1563_s2, 2048 }
  0x2b   : > { %p1096_p1 = scmp.ne.s32.totalorder %s1563_s2, %s1095_s4  ;;  %p1102_p10 = scmp.lt.u32.totalorder %s1095_s4, %s1563_s2 }
  0x2d   : > { %p1098_p4 = pnand %p1096_p1, %p1069_p13 }
  0x2f   : > { %p1099_p6 = pneg %p1098_p4 }
  0x31   : > { %p1104_p3 = pnand %p1102_p10, %p1099_p6 }
  0x33   : > { %1107 = shalt.err (!%p1104_p3)
}
  0x34   : > { %s1108_s26 = scalar_lea.vmem %s1338_s29, 2048  ;;  %p1116_p12 = scmp.lt.s32.totalorder %s1338_s29, %s1338_s29 }
  0x35   : > { %p1109_p5 = scmp.ne.s32.totalorder %s1338_s29, %s1108_s26  ;;  %p1117_p0 = scmp.lt.s32.totalorder %s1108_s26, %s1108_s26 }
  0x37   : > { %p1111_p7 = pnand %p1109_p5, %p1069_p13  ;;  %p1118_p1 = por %p1117_p0, %p1116_p12 }
  0x39   : > { %p1112_p9 = pneg %p1111_p7 }
  0x3b   : > { %p1119_p4 = pnand %p1118_p1, %p1112_p9 }
  0x3d   : > { %1122 = shalt.err (!%p1119_p4)
}
  0x3e   : > { %982 = dma.hbm_to_vmem [thread:$0]  (!%p1334_p11), %s1563_s2, 2048, %s1338_s29, [#allocation7], %s1243_s11, %s1243_s11, %s1244_s18  }
  0x3f   : > { %s32_s27 = sadd.s32 1, %s1235_s16  ;;  %s39_s19 = sadd.s32 1, %s1227_s14 }
  0x40   : > { %p34_p13 = scmp.ge.s32.totalorder %s32_s27, 2  ;;  %p46_p6 = scmp.ne.s32.totalorder %s1227_s14, %s1223_s13 }
  0x41   : > { %p47_p10 = scmp.eq.s32.totalorder %s1239_s17, 0  ;;  %p993_p3 = scmp.lt.s32.totalorder %s1239_s17, 2 }
  0x42   : > { %s1588_s27 = smov (%p34_p13, %s32_s27), 0  ;;  %p1408_p7 = por %p1307_p2, %p46_p6 }
  0x43   : > { %p48_p5 = por %p47_p10, %p46_p6  ;;  %s36_s28 = ssub.s32 %s1235_s16, %s1588_s27 }
  0x44   : > { %s1575_s25 = scalar_select %p1408_p7, 1, 0 }
  0x45   : > { %s185_s30 = sand.u32 1, %s1227_s14   ;;  %p37_p9 = scmp.eq.s32.totalorder %s36_s28, 0 }
  0x46   : > { %s749_s29 = sshll.u32 %s185_s30, 6  ;;  %s762_s4 = sshll.u32 %s1235_s16, 10 }
  0x47   : > { %s1417_s5 = scalar_select %p37_p9, %s1227_s14, %s39_s19  }
  0x48   : > { %s1422_s8 = scalar_lea.hbm %s1561_s0, %s762_s4  ;;  %s189_s21 = scalar_lea.vmem [#allocation3], %s749_s29 }
  0x49   : > { %s196_s26 = sshll.u32 %s189_s21, 4  ;;  %p1426_p2 = pnand %p993_p3, %p48_p5  ;;  %s1430_s26 = int_to_ptr.vmem [resolvable:$true] %s196_s26 }
  0x4a   : > { %s1432_s10 = scalar_lea.sflag [#allocation4], %s185_s30  ;;  %s1123_s19 = scalar_lea.hbm %s1422_s8, 1024 }
  0x4b   : > { %p1124_p11 = scmp.ne.s32.totalorder %s1422_s8, %s1123_s19  ;;  %p1125_p12 = pneg %p1426_p2 }
  0x4c   : > { %s1128_s4 = scalar_lea.hbm %s1561_s0, 2048  ;;  %p1129_p4 = scmp.lt.u32.totalorder %s1422_s8, %s1561_s0 }
  0x4d   : > { %p1126_p0 = pnand %p1125_p12, %p1124_p11  ;;  %p1130_p13 = scmp.lt.u32.totalorder %s1128_s4, %s1123_s19 }
  0x4e   : > { %p1132_p10 = scmp.lt.u32.totalorder %s1123_s19, %s1422_s8 }
  0x4f   : > { %p1127_p1 = pneg %p1126_p0  ;;  %p1131_p6 = por %p1130_p13, %p1129_p4 }
  0x51   : > { %p1133_p3 = por %p1132_p10, %p1131_p6 }
  0x53   : > { %p1134_p5 = pnand %p1133_p3, %p1127_p1 }
  0x55   : > { %1137 = shalt.err (!%p1134_p5)
}
  0x56   : > { %s1138_s30 = scalar_lea.vmem %s1430_s26, 1024  ;;  %s1245_s21 = smov [#allocation3]  }
  0x57   : > { %p1139_p9 = scmp.ne.s32.totalorder %s1430_s26, %s1138_s30  ;;  %s1143_s28 = sshll.u32 %s1245_s21, 4  ;;  %s1144_s28 = int_to_ptr.vmem [resolvable:$false] %s1143_s28 }
  0x58   : > { %s1145_s29 = scalar_lea.vmem %s1144_s28, 2048  ;;  %p1146_p7 = scmp.lt.s32.totalorder %s1430_s26, %s1144_s28 }
  0x59   : > { %p1141_p11 = pnand %p1139_p9, %p1125_p12  ;;  %p1147_p4 = scmp.lt.s32.totalorder %s1145_s29, %s1138_s30 }
  0x5b   : > { %p1142_p0 = pneg %p1141_p11  ;;  %p1148_p13 = por %p1147_p4, %p1146_p7 }
  0x5d   : > { %p1149_p6 = pnand %p1148_p13, %p1142_p0 }
  0x5f   : > { %1152 = shalt.err (!%p1149_p6)
}
  0x60   : > { %986 = dma.hbm_to_vmem [thread:$0]  (!%p1426_p2), %s1422_s8, 1024, %s1430_s26, %s1432_s10, %s1243_s11, %s1243_s11, %s1244_s18  }
  0x61   : > { %208 = sbr.rel (%p1323_p8) target bundleno = 622 (0x26e), region = 32  ;;  %s1466_s19 = sand.u32 (!%p1323_p8), 1, %s1223_s13  }
  0x62   : > { %s753_s4 = sshll.u32 (!%p1323_p8), %s1466_s19, 6  ;;  %s211_s6 = scalar_lea.sflag (!%p1323_p8), [#allocation4], %s1466_s19 }
  0x63   : > { %s1472_s9 = scalar_lea.vmem (!%p1323_p8), [#allocation3], %s753_s4  ;;  %p1577_p7 = scmp.ne.s32.totalorder (!%p1323_p8), %s1571_s22, 0 }
  0x68   : > { %1206 = dma.done.wait (%p1577_p7), %s211_s6, 1024  }
  0x69   : > { %1208 = vsyncadd (%p1577_p7), %s211_s6, 4294966272  ;;  %p1578_p2 = scmp.ne.s32.totalorder %s1569_s20, 0 }
  0x6b   : > { %1210 = dma.done.wait (%p1578_p2), [#allocation7], 4096  }
  0x6c   : > { %1212 = vsyncadd (%p1578_p2), [#allocation7], 4294963200  ;;  %v268_v0 = vld [vmem:[#allocation6] sm:$0xff]  ;;  %v269_v1 = vld [vmem:[#allocation6 + $0x8] sm:$0xff]  ;;  %s244_s20 = scalar_lea.vmem [#allocation9], %s753_s4  ;;  %s763_s24 = sshll.u32 %s1231_s15, 10 }
  0x6d   : > { %v270_v2 = vld [vmem:[#allocation6 + $0x10] sm:$0xff]  ;;  %v900_v3 = vpack.c.bf16 %v269_v1, %v268_v0  ;;  %v271_v4 = vld [vmem:[#allocation6 + $0x18] sm:$0xff]  ;;  %v272_v6 = vld [vmem:[#allocation6 + $0x20] sm:$0xff]  ;;  %s639_s22 = sshll.u32 %s244_s20, 4  ;;  %s1512_s8 = scalar_lea.hbm %s1564_s3, %s763_s24  ;;  %s1507_s22 = int_to_ptr.vmem [resolvable:$true] %s639_s22 }
  0x6e   : > { %v904_v5 = vpack.c.bf16 %v271_v4, %v270_v2  ;;  %v273_v7 = vld [vmem:[#allocation6 + $0x28] sm:$0xff]  ;;  %v260_v9 = vld [vmem:[%s1472_s9] sm:$0xff]  ;;  %v274_v10 = vld [vmem:[#allocation6 + $0x30] sm:$0xff]  ;;  %s626_s26 = scalar_lea.sflag [#allocation5], %s1466_s19  ;;  %s1153_s10 = scalar_lea.vmem %s1507_s22, 1024 }
  0x6f   : > { %901 = vmatprep.subr.bf16.mxu0 %v900_v3  ;;  %v908_v8 = vpack.c.bf16 %v273_v7, %v272_v6  ;;  %v275_v11 = vld [vmem:[#allocation6 + $0x38] sm:$0xff]  ;;  %844 = vmatprep.mubr.f32.mxu0 %v260_v9  ;;  %v469_v12 = vld [vmem:[#allocation8] sm:$0xff]  ;;  %v470_v13 = vld [vmem:[#allocation8 + $0x8] sm:$0xff]  ;;  %p1154_p8 = scmp.ne.s32.totalorder %s1507_s22, %s1153_s10  ;;  %p1579_p12 = scmp.ne.s32.totalorder %s1575_s25, 0 }
  0x70   : > { %903 = vmatpush3.bf16.msra.mxu0 %v900_v3  ;;  %v912_v14 = vpack.c.bf16 %v275_v11, %v274_v10  ;;  %v932_v15 = vpack.c.bf16 %v470_v13, %v469_v12  ;;  %v276_v16 = vld [vmem:[#allocation6 + $0x40] sm:$0xff]  ;;  %v277_v17 = vld [vmem:[#allocation6 + $0x48] sm:$0xff]  ;;  %v278_v19 = vld [vmem:[#allocation6 + $0x50] sm:$0xff]  ;;  %s1246_s15 = smov [#allocation9]  }
  0x71   : > { %905 = vmatprep.subr.bf16.mxu0 %v904_v5  ;;  %v916_v18 = vpack.c.bf16 %v277_v17, %v276_v16  ;;  %v279_v20 = vld [vmem:[#allocation6 + $0x58] sm:$0xff]  ;;  %v280_v22 = vld [vmem:[#allocation6 + $0x60] sm:$0xff]  ;;  %v281_v23 = vld [vmem:[#allocation6 + $0x68] sm:$0xff]  ;;  %p1155_p1 = pnand %p1154_p8, %p1579_p12  ;;  %s1157_s7 = sshll.u32 %s1246_s15, 4  ;;  %s1158_s7 = int_to_ptr.vmem [resolvable:$false] %s1157_s7 }
  0x72   : > { %933 = vmatprep.subr.bf16.mxu1 %v932_v15  ;;  %v920_v21 = vpack.c.bf16 %v279_v20, %v278_v19  ;;  %v924_v24 = vpack.c.bf16 %v281_v23, %v280_v22  ;;  %v282_v25 = vld [vmem:[#allocation6 + $0x70] sm:$0xff]  ;;  %v283_v26 = vld [vmem:[#allocation6 + $0x78] sm:$0xff]  ;;  %v261_v28 = vld [vmem:[%s1472_s9 + $0x8] sm:$0xff]  ;;  %s1159_s30 = scalar_lea.vmem %s1158_s7, 2048  ;;  %p1160_p3 = scmp.lt.s32.totalorder %s1507_s22, %s1158_s7 }
  0x73   : > { %935 = vmatpush3.bf16.msra.mxu1 %v932_v15  ;;  %v928_v27 = vpack.c.bf16 %v283_v26, %v282_v25  ;;  %v262_v29 = vld [vmem:[%s1472_s9 + $0x10] sm:$0xff]  ;;  %v263_v30 = vld [vmem:[%s1472_s9 + $0x18] sm:$0xff]  ;;  %v264_v31 = vld [vmem:[%s1472_s9 + $0x20] sm:$0xff]  ;;  %p1156_p10 = pneg %p1155_p1  ;;  %p1161_p5 = scmp.lt.s32.totalorder %s1159_s30, %s1153_s10 }
  0x74   : > { %907 = vmatpush3.bf16.msra.mxu0 %v904_v5  ;;  %v265_v32 = vld [vmem:[%s1472_s9 + $0x28] sm:$0xff]  ;;  %v266_v33 = vld [vmem:[%s1472_s9 + $0x30] sm:$0xff]  ;;  %v267_v34 = vld [vmem:[%s1472_s9 + $0x38] sm:$0xff] }
  0x75   : > { %909 = vmatprep.subr.bf16.mxu0 %v908_v8  ;;  %v471_v35 = vld [vmem:[#allocation8 + $0x10] sm:$0xff]  ;;  %v472_v36 = vld [vmem:[#allocation8 + $0x18] sm:$0xff]  ;;  %v473_v38 = vld [vmem:[#allocation8 + $0x20] sm:$0xff]  ;;  %p1162_p9 = por %p1161_p5, %p1160_p3 }
  0x76   : > { %v936_v37 = vpack.c.bf16 %v472_v36, %v471_v35  ;;  %v474_v39 = vld [vmem:[#allocation8 + $0x28] sm:$0xff]  ;;  %v475_v41 = vld [vmem:[#allocation8 + $0x30] sm:$0xff]  ;;  %v476_v42 = vld [vmem:[#allocation8 + $0x38] sm:$0xff] }
  0x77   : > { %v940_v40 = vpack.c.bf16 %v474_v39, %v473_v38  ;;  %v944_v43 = vpack.c.bf16 %v476_v42, %v475_v41  ;;  %v477_v44 = vld [vmem:[#allocation8 + $0x40] sm:$0xff]  ;;  %v478_v45 = vld [vmem:[#allocation8 + $0x48] sm:$0xff]  ;;  %v479_v47 = vld [vmem:[#allocation8 + $0x50] sm:$0xff]  ;;  %p1163_p11 = pnand %p1162_p9, %p1156_p10 }
  0x78   : > { %911 = vmatpush3.bf16.msra.mxu0 %v908_v8  ;;  %937 = vmatprep.subr.bf16.mxu1 %v936_v37  ;;  %v948_v46 = vpack.c.bf16 %v478_v45, %v477_v44  ;;  %v480_v48 = vld [vmem:[#allocation8 + $0x58] sm:$0xff]  ;;  %v481_v50 = vld [vmem:[#allocation8 + $0x60] sm:$0xff]  ;;  %v482_v51 = vld [vmem:[#allocation8 + $0x68] sm:$0xff] }
  0x79   : > { %913 = vmatprep.subr.bf16.mxu0 %v912_v14  ;;  %939 = vmatpush3.bf16.msra.mxu1 %v936_v37  ;;  %v952_v49 = vpack.c.bf16 %v480_v48, %v479_v47  ;;  %v956_v52 = vpack.c.bf16 %v482_v51, %v481_v50  ;;  %v483_v53 = vld [vmem:[#allocation8 + $0x70] sm:$0xff]  ;;  %v484_v54 = vld [vmem:[#allocation8 + $0x78] sm:$0xff] }
  0x7a   : > { %941 = vmatprep.subr.bf16.mxu1 %v940_v40  ;;  %v960_v55 = vpack.c.bf16 %v484_v54, %v483_v53 }
  0x7c   : > { %915 = vmatpush3.bf16.msra.mxu0 %v912_v14 }
  0x7d   : > { %917 = vmatprep.subr.bf16.mxu0 %v916_v18  ;;  %943 = vmatpush3.bf16.msra.mxu1 %v940_v40 }
  0x7e   : > { %945 = vmatprep.subr.bf16.mxu1 %v944_v43 }
  0x80   : > { %919 = vmatpush3.bf16.msra.mxu0 %v916_v18 }
  0x81   : > { %921 = vmatprep.subr.bf16.mxu0 %v920_v21  ;;  %947 = vmatpush3.bf16.msra.mxu1 %v944_v43 }
  0x82   : > { %949 = vmatprep.subr.bf16.mxu1 %v948_v46 }
  0x84   : > { %923 = vmatpush3.bf16.msra.mxu0 %v920_v21 }
  0x85   : > { %925 = vmatprep.subr.bf16.mxu0 %v924_v24  ;;  %951 = vmatpush3.bf16.msra.mxu1 %v948_v46 }
  0x86   : > { %953 = vmatprep.subr.bf16.mxu1 %v952_v49 }
  0x88   : > { %927 = vmatpush3.bf16.msra.mxu0 %v924_v24 }
  0x89   : > { %929 = vmatprep.subr.bf16.mxu0 %v928_v27  ;;  %955 = vmatpush3.bf16.msra.mxu1 %v952_v49 }
  0x8a   : > { %957 = vmatprep.subr.bf16.mxu1 %v956_v52 }
  0x8c   : > { %931 = vmatpush3.bf16.msra.mxu0 %v928_v27 }
  0x8d   : > { %959 = vmatpush3.bf16.msra.mxu1 %v956_v52 }
  0x8e   : > { %961 = vmatprep.subr.bf16.mxu1 %v960_v55 }
  0x8f   : > { %845 = vmatmul.mubr.f32.vlgmr.msra.gmra.mrb[0].mxu0 %v261_v28 }
  0x90   : > { %847 = vmatprep.mubr.f32.mxu0 %v262_v29 }
  0x91   : > { %963 = vmatpush3.bf16.msra.mxu1 %v960_v55 }
  0x93   : > { %848 = vmatmul.mubr.f32.gmra.mrb[2].mxu0 %v263_v30 }
  0x94   : > { %850 = vmatprep.mubr.f32.mxu0 %v264_v31 }
  0x97   : > { %851 = vmatmul.mubr.f32.gmra.mrb[4].mxu0 %v265_v32 }
  0x98   : > { %853 = vmatprep.mubr.f32.mxu0 %v266_v33 }
  0x9b   : > { %854 = vmatmul.mubr.f32.gmra.mrb[6].mxu0 %v267_v34 }
 0x162   : > { %v846_v56 = vpop.f32.mrb[0].mxu0 }
 0x163   : > { %v398_v57 = vmul.f32 %v846_v56, %v846_v56  ;;  %v350_v58 = vpop.f32.mrb[1].mxu0  ;;  %v390_v45 = vmul.f32 0.5, %v846_v56 }
 0x164   : > { %v397_v59 = vmul.f32 %v350_v58, %v350_v58  ;;  %v389_v43 = vmul.f32 0.5, %v350_v58 }
 0x165   : > { %v406_v60 = vmul.f32 %v846_v56, %v398_v57 }
 0x166   : > { %v405_v61 = vmul.f32 %v397_v59, %v350_v58  ;;  %v1490_v62 = vpop.f32.mrb[2].mxu0 }
 0x167   : > { %v414_v63 = vmul.f32 0.044715, %v406_v60  ;;  %v400_v0 = vmul.f32 %v1490_v62, %v1490_v62  ;;  %v360_v1 = vpop.f32.mrb[3].mxu0  ;;  %v392_v53 = vmul.f32 0.5, %v1490_v62 }
 0x168   : > { %v413_v2 = vmul.f32 0.044715, %v405_v61  ;;  %v399_v3 = vmul.f32 %v360_v1, %v360_v1  ;;  %v391_v51 = vmul.f32 0.5, %v360_v1 }
 0x169   : > { %v422_v4 = vadd.f32 %v846_v56, %v414_v63  ;;  %v408_v5 = vmul.f32 %v1490_v62, %v400_v0 }
 0x16a   : > { %v407_v6 = vmul.f32 %v399_v3, %v360_v1  ;;  %v1495_v7 = vpop.f32.mrb[4].mxu0  ;;  %v421_v8 = vadd.f32 %v413_v2, %v350_v58 }
 0x16b   : > { %v430_v9 = vmul.f32 0.7978846, %v422_v4  ;;  %v416_v10 = vmul.f32 0.044715, %v408_v5  ;;  %v402_v11 = vmul.f32 %v1495_v7, %v1495_v7  ;;  %v370_v12 = vpop.f32.mrb[5].mxu0  ;;  %v394_v61 = vmul.f32 0.5, %v1495_v7 }
 0x16c   : > { %v415_v13 = vmul.f32 0.044715, %v407_v6  ;;  %v401_v14 = vmul.f32 %v370_v12, %v370_v12  ;;  %v429_v15 = vmul.f32 0.7978846, %v421_v8  ;;  %v393_v58 = vmul.f32 0.5, %v370_v12 }
 0x16d   : > { %1051 = vtanh.f32 %v430_v9  ;;  %v424_v16 = vadd.f32 %v1490_v62, %v416_v10  ;;  %v410_v17 = vmul.f32 %v1495_v7, %v402_v11 }
 0x16e   : > { %v423_v18 = vadd.f32 %v415_v13, %v360_v1  ;;  %v409_v19 = vmul.f32 %v401_v14, %v370_v12  ;;  %v855_v20 = vpop.f32.mrb[6].mxu0  ;;  %1053 = vtanh.f32 %v429_v15 }
 0x16f   : > { %v432_v21 = vmul.f32 0.7978846, %v424_v16  ;;  %v418_v22 = vmul.f32 0.044715, %v410_v17  ;;  %v404_v23 = vmul.f32 %v855_v20, %v855_v20  ;;  %v380_v24 = vpop.f32.mrb[7].mxu0  ;;  %v396_v5 = vmul.f32 0.5, %v855_v20 }
 0x170   : > { %v431_v25 = vmul.f32 0.7978846, %v423_v18  ;;  %v417_v26 = vmul.f32 0.044715, %v409_v19  ;;  %v403_v27 = vmul.f32 %v380_v24, %v380_v24  ;;  %v395_v4 = vmul.f32 0.5, %v380_v24 }
 0x171   : > { %1055 = vtanh.f32 %v432_v21  ;;  %v426_v28 = vadd.f32 %v1495_v7, %v418_v22  ;;  %v412_v29 = vmul.f32 %v855_v20, %v404_v23 }
 0x172   : > { %1057 = vtanh.f32 %v431_v25  ;;  %v425_v30 = vadd.f32 %v417_v26, %v370_v12  ;;  %v411_v31 = vmul.f32 %v403_v27, %v380_v24 }
 0x173   : > { %v434_v32 = vmul.f32 0.7978846, %v426_v28  ;;  %v420_v33 = vmul.f32 0.044715, %v412_v29 }
 0x174   : > { %v433_v34 = vmul.f32 0.7978846, %v425_v30  ;;  %v419_v35 = vmul.f32 0.044715, %v411_v31 }
 0x175   : > { %1059 = vtanh.f32 %v434_v32  ;;  %v428_v36 = vadd.f32 %v855_v20, %v420_v33 }
 0x176   : > { %1061 = vtanh.f32 %v433_v34  ;;  %v427_v37 = vadd.f32 %v419_v35, %v380_v24 }
 0x177   : > { %v1052_v38 = vpop.eup %1051  ;;  %v436_v39 = vmul.f32 0.7978846, %v428_v36 }
 0x178   : > { %v1054_v40 = vpop.eup %1053  ;;  %v435_v41 = vmul.f32 0.7978846, %v427_v37  ;;  %v446_v42 = vadd.f32 1.0, %v1052_v38 }
 0x179   : > { %1063 = vtanh.f32 %v436_v39  ;;  %v445_v44 = vadd.f32 1.0, %v1054_v40 }
 0x17a   : > { %1065 = vtanh.f32 %v435_v41  ;;  %v454_v49 = vmul.f32 %v446_v42, %v390_v45 }
 0x17b   : > { %v1056_v46 = vpop.eup %1055  ;;  %v453_v47 = vmul.f32 %v445_v44, %v389_v43 }
 0x17c   : > { %v1058_v48 = vpop.eup %1057  ;;  %v448_v50 = vadd.f32 1.0, %v1056_v46 }
 0x17d   : > { %888 = vmatprep.mubr.f32.mxu1 %v453_v47  ;;  %v447_v52 = vadd.f32 1.0, %v1058_v48 }
 0x17e   : > { %889 = vmatmul.mubr.f32.vlgmr.msra.gmra.mrb[0].mxu1 %v454_v49  ;;  %v456_v59 = vmul.f32 %v448_v50, %v392_v53 }
 0x17f   : > { %v1060_v54 = vpop.eup %1059  ;;  %v455_v55 = vmul.f32 %v447_v52, %v391_v51 }
 0x180   : > { %v1062_v57 = vpop.eup %1061  ;;  %v450_v60 = vadd.f32 1.0, %v1060_v54 }
 0x181   : > { %891 = vmatprep.mubr.f32.mxu1 %v455_v55  ;;  %v449_v56 = vadd.f32 1.0, %v1062_v57 }
 0x182   : > { %892 = vmatmul.mubr.f32.gmra.mrb[2].mxu1 %v456_v59  ;;  %v458_v2 = vmul.f32 %v450_v60, %v394_v61 }
 0x183   : > { %v1064_v63 = vpop.eup %1063  ;;  %v457_v0 = vmul.f32 %v449_v56, %v393_v58 }
 0x184   : > { %v1066_v1 = vpop.eup %1065  ;;  %v452_v3 = vadd.f32 1.0, %v1064_v63 }
 0x185   : > { %894 = vmatprep.mubr.f32.mxu1 %v457_v0  ;;  %v451_v62 = vadd.f32 1.0, %v1066_v1 }
 0x186   : > { %895 = vmatmul.mubr.f32.gmra.mrb[4].mxu1 %v458_v2  ;;  %v460_v8 = vmul.f32 %v452_v3, %v396_v5 }
 0x187   : > { %v459_v6 = vmul.f32 %v451_v62, %v395_v4 }
 0x189   : > { %897 = vmatprep.mubr.f32.mxu1 %v459_v6 }
 0x18a   : > { %898 = vmatmul.mubr.f32.gmra.mrb[6].mxu1 %v460_v8 }
 0x251   : > { %v890_v9 = vpop.f32.mrb[0].mxu1 }
 0x252   : > { %618 = vst [vmem:[%s244_s20 + $0x8] sm:$0xff] %v890_v9  ;;  %v551_v7 = vpop.f32.mrb[1].mxu1 }
 0x253   : > { %617 = vst [vmem:[%s244_s20] sm:$0xff] %v551_v7 }
 0x255   : > { %v893_v10 = vpop.f32.mrb[2].mxu1 }
 0x256   : > { %620 = vst [vmem:[%s244_s20 + $0x18] sm:$0xff] %v893_v10  ;;  %v561_v11 = vpop.f32.mrb[3].mxu1 }
 0x257   : > { %619 = vst [vmem:[%s244_s20 + $0x10] sm:$0xff] %v561_v11 }
 0x259   : > { %v896_v12 = vpop.f32.mrb[4].mxu1 }
 0x25a   : > { %622 = vst [vmem:[%s244_s20 + $0x28] sm:$0xff] %v896_v12  ;;  %v571_v13 = vpop.f32.mrb[5].mxu1 }
 0x25b   : > { %621 = vst [vmem:[%s244_s20 + $0x20] sm:$0xff] %v571_v13 }
 0x25d   : > { %v899_v14 = vpop.f32.mrb[6].mxu1 }
 0x25e   : > { %624 = vst [vmem:[%s244_s20 + $0x38] sm:$0xff] %v899_v14  ;;  %v581_v15 = vpop.f32.mrb[7].mxu1 }
 0x25f   : > { %623 = vst [vmem:[%s244_s20 + $0x30] sm:$0xff] %v581_v15 }
 0x260   : > { %1166 = shalt.err (!%p1163_p11)
}
 0x261   : > { %s1167_s21 = scalar_lea.hbm %s1512_s8, 1024  ;;  %s1171_s4 = scalar_lea.hbm %s1564_s3, 2048 }
 0x262   : > { %p1168_p0 = scmp.ne.s32.totalorder %s1512_s8, %s1167_s21  ;;  %p1172_p6 = scmp.lt.u32.totalorder %s1512_s8, %s1564_s3 }
 0x263   : > { %p1173_p7 = scmp.lt.u32.totalorder %s1171_s4, %s1167_s21  ;;  %p1175_p8 = scmp.lt.u32.totalorder %s1167_s21, %s1512_s8 }
 0x264   : > { %p1169_p4 = pnand %p1168_p0, %p1579_p12 }
 0x265   : > { %p1174_p2 = por %p1173_p7, %p1172_p6 }
 0x266   : > { %p1170_p13 = pneg %p1169_p4 }
 0x267   : > { %p1176_p1 = por %p1175_p8, %p1174_p2 }
 0x269   : > { %p1177_p10 = pnand %p1176_p1, %p1170_p13 }
 0x26b   : > { %1180 = shalt.err (!%p1177_p10)
}
 0x26c   : > { %s1247_s20 = smov 128   ;;  %s1248_s24 = smov 8  }
 0x26d   : > { %974 = dma.vmem_to_hbm [thread:$0]  (%p1579_p12), %s1507_s22, 1024, %s1512_s8, %s626_s26, %s1247_s20, %s1247_s20, %s1248_s24  }
 0x26e PF: > { %s654_s11 = sand.u32 1, %s1219_s12   ;;  %p1580_p3 = scmp.ne.s32.totalorder %s1572_s23, 0 }
 0x26f   : > { %p1581_p5 = scmp.ge.s32.totalorder %s1239_s17, 2  ;;  %s655_s18 = scalar_lea.sflag [#allocation5], %s654_s11 }
 0x271   : > { %p988_p9 = pnand %p1581_p5, %p1580_p3 }
 0x273   : > { %1214 = dma.done.wait (!%p988_p9), %s655_s18, 1024  }
 0x274   : > { %1216 = vsyncadd (!%p988_p9), %s655_s18, 4294966272  ;;  %s20_s17 = sadd.s32 1, %s1239_s17   ;;  %s1582_s12 = smov %s1223_s13 }
 0x275   : > { %p17_p11 = scmp.ge.s32.totalorder %s20_s17, 4   ;;  %s1583_s13 = smov %s1227_s14 }
 0x276   : > { %s1584_s14 = smov %s1417_s5  ;;  %s1585_s15 = smov %s1235_s16 }
 0x277   : > { %s1586_s16 = smov %s1588_s27  ;;  %19 = sbr.rel (!%p17_p11) target bundleno = 7 (0x7), region = 95 }
 0x27e   :  { %660 = vsyncpa [#allocation4], 1 }
 0x27f   :  { %662 = vsyncpa [#allocation4 + $0x1], 1 }
 0x280   :  { %663 = vsyncpa [#allocation7], 1 }
 0x281   :  { %664 = vsyncpa [#allocation5], 1 }
 0x282   :  { %666 = vsyncpa [#allocation5 + $0x1], 1 }

</bundles_post_ra>
